<compile_context>
chip_gen: v7x
topology: tpu7x:2x2x1
jax: 0.10.0
libtpu: 0.0.40
codegen_flags: <defaults>
</compile_context>

<pallas_src>
import functools

import jax
import jax.numpy as jnp
from jax.experimental import pallas as pl
from jax.experimental.pallas import tpu as pltpu


# ---------------------------------------------------------------------------
# Config (stand-in for the YAML file)
# ---------------------------------------------------------------------------

CONFIG = {
    "network": {"input_dim": 32},
    "layers": [
        {"type": "KAN", "output": 64, "num_kernels": 4, "activation": "ReLU"},
        {"type": "FC", "units": 32, "activation": "Tanh", "dropout": 0.1},
    ],
}

BATCH_TILE = 8  # one sublane-aligned batch tile per grid step


# ---------------------------------------------------------------------------
# Fused Pallas kernel
# ---------------------------------------------------------------------------

def _apply_activation(y, name):
    if name == "ReLU":
        return jnp.maximum(y, 0.0)
    if name == "Tanh":
        return jnp.tanh(y)
    if name == "Sigmoid":
        return jax.nn.sigmoid(y)
    if name == "LeakyReLU":
        return jnp.where(y > 0.0, y, 0.01 * y)
    return y


def _fused_predictor_kernel(*refs, meta):
    """Fused forward: encoder linear -> L2 normalize -> decoder layers.

    Ref layout (all VMEM, one batch tile per grid step):
      x_ref          [TB, F_in]
      enc_w, enc_b   [F_in, D0], [1, D0]
      per decoder layer:
        KAN: w [K*Din, Dout], b [1, Dout], centers_vec [1, K*Din],
             inv_two_w2_vec [1, K*Din]
        FC : w [Din, Dout], b [1, Dout]
      out_ref        [TB, 2]
    """
    idx = 0
    x_ref = refs[idx]; idx += 1
    enc_w_ref = refs[idx]; idx += 1
    enc_b_ref = refs[idx]; idx += 1

    # Encoder stand-in: h = x @ W_enc + b_enc
    h = jnp.dot(x_ref[...], enc_w_ref[...],
                preferred_element_type=jnp.float32) + enc_b_ref[...]

    # F.normalize(h, p=2, dim=1) == h / max(||h||, 1e-12)
    #  max(sqrt(ss), 1e-12) == sqrt(max(ss, 1e-24)) -> use rsqrt (EUP).
    ss = jnp.sum(h * h, axis=1, keepdims=True)
    h = h * jax.lax.rsqrt(jnp.maximum(ss, 1e-24))

    # Decoder (Dropout is identity at inference time).
    # TODO(synk): training-mode dropout not implemented (inference path only).
    for layer in meta:
        if layer["type"] == "KAN":
            K = layer["K"]
            w_ref = refs[idx]; b_ref = refs[idx + 1]
            c_ref = refs[idx + 2]; s_ref = refs[idx + 3]
            idx += 4
            # Single [B, K*Din] x [K*Din, Dout] matmul instead of K tiny ones.
            x_tiled = jnp.concatenate([h] * K, axis=-1)        # [TB, K*Din]
            phi = jnp.exp(-((x_tiled - c_ref[...]) ** 2) * s_ref[...])
            y = jnp.dot(phi, w_ref[...],
                        preferred_element_type=jnp.float32) + b_ref[...]
        else:  # FC
            w_ref = refs[idx]; b_ref = refs[idx + 1]
            idx += 2
            y = jnp.dot(h, w_ref[...],
                        preferred_element_type=jnp.float32) + b_ref[...]
        h = _apply_activation(y, layer["activation"])

    out_ref = refs[idx]
    out_ref[...] = h.astype(out_ref.dtype)


# ---------------------------------------------------------------------------
# Parameter construction (deterministic, in-script; all layout prep hoisted)
# ---------------------------------------------------------------------------

def kaiming_uniform(key, fan_in, fan_out):
    # nn.init.kaiming_uniform_(w, nonlinearity='relu'): bound = sqrt(6 / fan_in)
    bound = (6.0 / fan_in) ** 0.5
    return jax.random.uniform(key, (fan_in, fan_out), jnp.float32, -bound, bound)


def build_params(key, in_features, config):
    keys = jax.random.split(key, 16)
    ki = iter(range(16))
    params = {}

    # Encoder stand-in: [B, C*H*W] -> [B, input_dim]
    input_dim = config["network"]["input_dim"]
    params["enc_w"] = (jax.random.normal(keys[next(ki)], (in_features, input_dim),
                                         jnp.float32) * 0.02)
    params["enc_b"] = jnp.zeros((1, input_dim), jnp.float32)

    # Decoder layers (weights pre-laid-out for the fused kernel)
    layers = []
    prev = input_dim
    for layer_cfg in config["layers"]:
        if layer_cfg["type"] == "KAN":
            out = layer_cfg["output"]
            K = layer_cfg.get("num_kernels", 4)
            # torch weights [Dout, Din, K] -> [K, Din, Dout] -> [K*Din, Dout]
            w_torch = jax.random.normal(keys[next(ki)], (out, prev, K), jnp.float32)
            w_mat = jnp.transpose(w_torch, (2, 1, 0)).reshape(K * prev, out)
            centers = jnp.linspace(-1.0, 1.0, K).astype(jnp.float32)
            widths = jnp.ones((K,), jnp.float32) * 0.1
            inv_two_w2 = 1.0 / (2.0 * widths * widths)
            layers.append({
                "type": "KAN",
                "K": K,
                "w": w_mat,
                "b": jnp.zeros((1, out), jnp.float32),
                # broadcast vectors ordered to match concatenate([x]*K, axis=-1)
                "centers_vec": jnp.repeat(centers, prev).reshape(1, K * prev),
                "inv_two_w2_vec": jnp.repeat(inv_two_w2, prev).reshape(1, K * prev),
                "activation": layer_cfg.get("activation", None),
            })
            prev = out
        elif layer_cfg["type"] == "FC":
            out = layer_cfg["units"]
            layers.append({
                "type": "FC",
                "w": kaiming_uniform(keys[next(ki)], prev, out),
                "b": jnp.zeros((1, out), jnp.float32),
                "activation": layer_cfg.get("activation", None),
            })
            prev = out
        else:
            raise ValueError(f"Unsupported layer type: {layer_cfg['type']}")

    # Final output head: Linear(prev, 2)
    layers.append({
        "type": "FC",
        "w": kaiming_uniform(keys[next(ki)], prev, 2),
        "b": jnp.zeros((1, 2), jnp.float32),
        "activation": None,
    })
    params["decoder"] = layers
    return params


# ---------------------------------------------------------------------------
# Forward pass (Predictor.forward) — single fused pallas_call
# ---------------------------------------------------------------------------

def predictor_forward(params, x_nchw, batch_tile=BATCH_TILE):
    B = x_nchw.shape[0]
    x_flat = x_nchw.reshape(B, -1).astype(jnp.float32)
    f_in = x_flat.shape[1]

    # Pad batch to a multiple of the sublane-aligned batch tile.
    n_tiles = max(1, pl.cdiv(B, batch_tile))
    b_pad = n_tiles * batch_tile
    if b_pad != B:
        x_flat = jnp.pad(x_flat, ((0, b_pad - B), (0, 0)))

    operands = [x_flat, params["enc_w"], params["enc_b"]]
    in_specs = [
        pl.BlockSpec((batch_tile, f_in), lambda i: (i, 0)),
        pl.BlockSpec(params["enc_w"].shape, lambda i: (0, 0)),
        pl.BlockSpec(params["enc_b"].shape, lambda i: (0, 0)),
    ]

    meta = []
    for layer in params["decoder"]:
        if layer["type"] == "KAN":
            layer_arrays = (layer["w"], layer["b"],
                            layer["centers_vec"], layer["inv_two_w2_vec"])
            meta.append({"type": "KAN", "K": layer["K"],
                         "activation": layer["activation"]})
        else:
            layer_arrays = (layer["w"], layer["b"])
            meta.append({"type": "FC", "activation": layer["activation"]})
        for arr in layer_arrays:
            operands.append(arr)
            in_specs.append(pl.BlockSpec(arr.shape, lambda i: (0, 0)))

    out_dim = params["decoder"][-1]["w"].shape[1]

    out = pl.pallas_call(
        functools.partial(_fused_predictor_kernel, meta=meta),
        out_shape=jax.ShapeDtypeStruct((b_pad, out_dim), jnp.float32),
        grid=(n_tiles,),
        in_specs=in_specs,
        out_specs=pl.BlockSpec((batch_tile, out_dim), lambda i: (i, 0)),
        compiler_params=pltpu.CompilerParams(
            dimension_semantics=("parallel",)),  # shards across v7x TCs for big B
    )(*operands)

    return out[:B]


# ---------------------------------------------------------------------------
# Main
# ---------------------------------------------------------------------------

if __name__ == "__main__":
    key = jax.random.PRNGKey(0)
    k_params, k_x = jax.random.split(key)

    B, C, H, W = 2, 4, 16, 16          # NCHW image input
    x = jax.random.normal(k_x, (B, C, H, W), jnp.float32)

    params = build_params(k_params, C * H * W, CONFIG)

    pred = predictor_forward(params, x)
    pred = jax.block_until_ready(pred)

    assert pred.shape == (B, 2), pred.shape
    assert pred.dtype == jnp.float32
    assert bool(jnp.all(jnp.isfinite(pred)))
    print("KERNEL_OK")
</pallas_src>

<mosaic_0001>
module attributes {stable_mosaic.version = 11 : i64} {
  func.func @_fused_predictor_kernel(%arg0: i32, %arg1: memref<8x1024xf32, #tpu.memory_space<vmem>>, %arg2: memref<1024x32xf32, #tpu.memory_space<vmem>>, %arg3: memref<1x32xf32, #tpu.memory_space<vmem>>, %arg4: memref<128x64xf32, #tpu.memory_space<vmem>>, %arg5: memref<1x64xf32, #tpu.memory_space<vmem>>, %arg6: memref<1x128xf32, #tpu.memory_space<vmem>>, %arg7: memref<1x128xf32, #tpu.memory_space<vmem>>, %arg8: memref<64x32xf32, #tpu.memory_space<vmem>>, %arg9: memref<1x32xf32, #tpu.memory_space<vmem>>, %arg10: memref<32x2xf32, #tpu.memory_space<vmem>>, %arg11: memref<1x2xf32, #tpu.memory_space<vmem>>, %arg12: memref<8x2xf32, #tpu.memory_space<vmem>>) attributes {dimension_semantics = [#tpu.dimension_semantics<parallel>], iteration_bounds = array<i64: 1>, scalar_prefetch = 0 : i64, scratch_operands = 0 : i64, tpu.core_type = #tpu.core_type<tc>, window_params = [{transform_indices = @transform_0, window_bounds = array<i64: 8, 1024>}, {pipeline_mode = #tpu.pipeline_mode<synchronous>, transform_indices = @transform_1, window_bounds = array<i64: 1024, 32>}, {pipeline_mode = #tpu.pipeline_mode<synchronous>, transform_indices = @transform_2, window_bounds = array<i64: 1, 32>}, {pipeline_mode = #tpu.pipeline_mode<synchronous>, transform_indices = @transform_3, window_bounds = array<i64: 128, 64>}, {pipeline_mode = #tpu.pipeline_mode<synchronous>, transform_indices = @transform_4, window_bounds = array<i64: 1, 64>}, {pipeline_mode = #tpu.pipeline_mode<synchronous>, transform_indices = @transform_5, window_bounds = array<i64: 1, 128>}, {pipeline_mode = #tpu.pipeline_mode<synchronous>, transform_indices = @transform_6, window_bounds = array<i64: 1, 128>}, {pipeline_mode = #tpu.pipeline_mode<synchronous>, transform_indices = @transform_7, window_bounds = array<i64: 64, 32>}, {pipeline_mode = #tpu.pipeline_mode<synchronous>, transform_indices = @transform_8, window_bounds = array<i64: 1, 32>}, {pipeline_mode = #tpu.pipeline_mode<synchronous>, transform_indices = @transform_9, window_bounds = array<i64: 32, 2>}, {pipeline_mode = #tpu.pipeline_mode<synchronous>, transform_indices = @transform_10, window_bounds = array<i64: 1, 2>}, {transform_indices = @transform_11, window_bounds = array<i64: 8, 2>}]} {
    %c0 = arith.constant 0 : index
    %c0_0 = arith.constant 0 : index
    %0 = vector.load %arg1[%c0, %c0_0] : memref<8x1024xf32, #tpu.memory_space<vmem>>, vector<8x1024xf32>
    %c0_1 = arith.constant 0 : index
    %c0_2 = arith.constant 0 : index
    %1 = vector.load %arg2[%c0_1, %c0_2] : memref<1024x32xf32, #tpu.memory_space<vmem>>, vector<1024x32xf32>
    %cst = arith.constant dense<0.000000e+00> : vector<8x32xf32>
    %2 = tpu.matmul %0, %1, %cst {dimension_numbers = #tpu.dot_dimension_numbers<[1], [0], [0], [1], [0, 0, 1, 1], [], []>} : vector<8x1024xf32>, vector<1024x32xf32>, vector<8x32xf32> -> vector<8x32xf32>
    %c0_3 = arith.constant 0 : index
    %c0_4 = arith.constant 0 : index
    %3 = vector.load %arg3[%c0_3, %c0_4] : memref<1x32xf32, #tpu.memory_space<vmem>>, vector<1x32xf32>
    %4 = vector.broadcast %3 : vector<1x32xf32> to vector<8x32xf32>
    %5 = arith.addf %2, %4 : vector<8x32xf32>
    %6 = arith.mulf %5, %5 : vector<8x32xf32>
    %cst_5 = arith.constant dense<0.000000e+00> : vector<8xf32>
    %7 = vector.multi_reduction <add>, %6, %cst_5 [1] : vector<8x32xf32> to vector<8xf32>
    %8 = vector.shape_cast %7 : vector<8xf32> to vector<8x1xf32>
    %cst_6 = arith.constant 1.000000e-24 : f32
    %9 = vector.broadcast %cst_6 : f32 to vector<8x1xf32>
    %10 = arith.maximumf %8, %9 : vector<8x1xf32>
    %11 = math.rsqrt %10 : vector<8x1xf32>
    %12 = vector.broadcast %11 : vector<8x1xf32> to vector<8x32xf32>
    %13 = arith.mulf %5, %12 : vector<8x32xf32>
    %14 = tpu.concatenate %13, %13, %13, %13 in 1 : vector<8x32xf32>, vector<8x32xf32>, vector<8x32xf32>, vector<8x32xf32> -> vector<8x128xf32>
    %c0_7 = arith.constant 0 : index
    %c0_8 = arith.constant 0 : index
    %15 = vector.load %arg6[%c0_7, %c0_8] : memref<1x128xf32, #tpu.memory_space<vmem>>, vector<1x128xf32>
    %16 = vector.broadcast %15 : vector<1x128xf32> to vector<8x128xf32>
    %17 = arith.subf %14, %16 : vector<8x128xf32>
    %18 = arith.mulf %17, %17 : vector<8x128xf32>
    %cst_9 = arith.constant 0.000000e+00 : f32
    %19 = vector.broadcast %cst_9 : f32 to vector<8x128xf32>
    %20 = arith.subf %19, %18 : vector<8x128xf32>
    %c0_10 = arith.constant 0 : index
    %c0_11 = arith.constant 0 : index
    %21 = vector.load %arg7[%c0_10, %c0_11] : memref<1x128xf32, #tpu.memory_space<vmem>>, vector<1x128xf32>
    %22 = vector.broadcast %21 : vector<1x128xf32> to vector<8x128xf32>
    %23 = arith.mulf %20, %22 : vector<8x128xf32>
    %24 = math.exp %23 : vector<8x128xf32>
    %c0_12 = arith.constant 0 : index
    %c0_13 = arith.constant 0 : index
    %25 = vector.load %arg4[%c0_12, %c0_13] : memref<128x64xf32, #tpu.memory_space<vmem>>, vector<128x64xf32>
    %cst_14 = arith.constant dense<0.000000e+00> : vector<8x64xf32>
    %26 = tpu.matmul %24, %25, %cst_14 {dimension_numbers = #tpu.dot_dimension_numbers<[1], [0], [0], [1], [0, 0, 1, 1], [], []>} : vector<8x128xf32>, vector<128x64xf32>, vector<8x64xf32> -> vector<8x64xf32>
    %c0_15 = arith.constant 0 : index
    %c0_16 = arith.constant 0 : index
    %27 = vector.load %arg5[%c0_15, %c0_16] : memref<1x64xf32, #tpu.memory_space<vmem>>, vector<1x64xf32>
    %28 = vector.broadcast %27 : vector<1x64xf32> to vector<8x64xf32>
    %29 = arith.addf %26, %28 : vector<8x64xf32>
    %cst_17 = arith.constant 0.000000e+00 : f32
    %30 = vector.broadcast %cst_17 : f32 to vector<8x64xf32>
    %31 = arith.maximumf %29, %30 : vector<8x64xf32>
    %c0_18 = arith.constant 0 : index
    %c0_19 = arith.constant 0 : index
    %32 = vector.load %arg8[%c0_18, %c0_19] : memref<64x32xf32, #tpu.memory_space<vmem>>, vector<64x32xf32>
    %cst_20 = arith.constant dense<0.000000e+00> : vector<8x32xf32>
    %33 = tpu.matmul %31, %32, %cst_20 {dimension_numbers = #tpu.dot_dimension_numbers<[1], [0], [0], [1], [0, 0, 1, 1], [], []>} : vector<8x64xf32>, vector<64x32xf32>, vector<8x32xf32> -> vector<8x32xf32>
    %c0_21 = arith.constant 0 : index
    %c0_22 = arith.constant 0 : index
    %34 = vector.load %arg9[%c0_21, %c0_22] : memref<1x32xf32, #tpu.memory_space<vmem>>, vector<1x32xf32>
    %35 = vector.broadcast %34 : vector<1x32xf32> to vector<8x32xf32>
    %36 = arith.addf %33, %35 : vector<8x32xf32>
    %37 = math.tanh %36 : vector<8x32xf32>
    %c0_23 = arith.constant 0 : index
    %c0_24 = arith.constant 0 : index
    %38 = vector.load %arg10[%c0_23, %c0_24] : memref<32x2xf32, #tpu.memory_space<vmem>>, vector<32x2xf32>
    %cst_25 = arith.constant dense<0.000000e+00> : vector<8x2xf32>
    %39 = tpu.matmul %37, %38, %cst_25 {dimension_numbers = #tpu.dot_dimension_numbers<[1], [0], [0], [1], [0, 0, 1, 1], [], []>} : vector<8x32xf32>, vector<32x2xf32>, vector<8x2xf32> -> vector<8x2xf32>
    %c0_26 = arith.constant 0 : index
    %c0_27 = arith.constant 0 : index
    %40 = vector.load %arg11[%c0_26, %c0_27] : memref<1x2xf32, #tpu.memory_space<vmem>>, vector<1x2xf32>
    %41 = vector.broadcast %40 : vector<1x2xf32> to vector<8x2xf32>
    %42 = arith.addf %39, %41 : vector<8x2xf32>
    %c0_28 = arith.constant 0 : index
    %c0_29 = arith.constant 0 : index
    %43 = vector.load %arg12[%c0_28, %c0_29] : memref<8x2xf32, #tpu.memory_space<vmem>>, vector<8x2xf32>
    tpu.vector_store %arg12[%c0_28, %c0_29], %42 {strides = array<i32>} : memref<8x2xf32, #tpu.memory_space<vmem>>, vector<8x2xf32>,
    return
  }
  func.func @transform_0(%arg0: i32) -> (i32, i32) {
    %c0_i32 = arith.constant 0 : i32
    %c0_i32_0 = arith.constant 0 : i32
    return %arg0, %c0_i32 : i32, i32
  }
  func.func @transform_1(%arg0: i32) -> (i32, i32) {
    %c0_i32 = arith.constant 0 : i32
    %c0_i32_0 = arith.constant 0 : i32
    %c0_i32_1 = arith.constant 0 : i32
    return %c0_i32, %c0_i32_0 : i32, i32
  }
  func.func @transform_2(%arg0: i32) -> (i32, i32) {
    %c0_i32 = arith.constant 0 : i32
    %c0_i32_0 = arith.constant 0 : i32
    %c0_i32_1 = arith.constant 0 : i32
    return %c0_i32, %c0_i32_0 : i32, i32
  }
  func.func @transform_3(%arg0: i32) -> (i32, i32) {
    %c0_i32 = arith.constant 0 : i32
    %c0_i32_0 = arith.constant 0 : i32
    %c0_i32_1 = arith.constant 0 : i32
    return %c0_i32, %c0_i32_0 : i32, i32
  }
  func.func @transform_4(%arg0: i32) -> (i32, i32) {
    %c0_i32 = arith.constant 0 : i32
    %c0_i32_0 = arith.constant 0 : i32
    %c0_i32_1 = arith.constant 0 : i32
    return %c0_i32, %c0_i32_0 : i32, i32
  }
  func.func @transform_5(%arg0: i32) -> (i32, i32) {
    %c0_i32 = arith.constant 0 : i32
    %c0_i32_0 = arith.constant 0 : i32
    %c0_i32_1 = arith.constant 0 : i32
    return %c0_i32, %c0_i32_0 : i32, i32
  }
  func.func @transform_6(%arg0: i32) -> (i32, i32) {
    %c0_i32 = arith.constant 0 : i32
    %c0_i32_0 = arith.constant 0 : i32
    %c0_i32_1 = arith.constant 0 : i32
    return %c0_i32, %c0_i32_0 : i32, i32
  }
  func.func @transform_7(%arg0: i32) -> (i32, i32) {
    %c0_i32 = arith.constant 0 : i32
    %c0_i32_0 = arith.constant 0 : i32
    %c0_i32_1 = arith.constant 0 : i32
    return %c0_i32, %c0_i32_0 : i32, i32
  }
  func.func @transform_8(%arg0: i32) -> (i32, i32) {
    %c0_i32 = arith.constant 0 : i32
    %c0_i32_0 = arith.constant 0 : i32
    %c0_i32_1 = arith.constant 0 : i32
    return %c0_i32, %c0_i32_0 : i32, i32
  }
  func.func @transform_9(%arg0: i32) -> (i32, i32) {
    %c0_i32 = arith.constant 0 : i32
    %c0_i32_0 = arith.constant 0 : i32
    %c0_i32_1 = arith.constant 0 : i32
    return %c0_i32, %c0_i32_0 : i32, i32
  }
  func.func @transform_10(%arg0: i32) -> (i32, i32) {
    %c0_i32 = arith.constant 0 : i32
    %c0_i32_0 = arith.constant 0 : i32
    %c0_i32_1 = arith.constant 0 : i32
    return %c0_i32, %c0_i32_0 : i32, i32
  }
  func.func @transform_11(%arg0: i32) -> (i32, i32) {
    %c0_i32 = arith.constant 0 : i32
    %c0_i32_0 = arith.constant 0 : i32
    return %arg0, %c0_i32 : i32, i32
  }
}

</mosaic_0001>

<bundles_post_ra>
// kernel: tpu_custom_call.1
= control target key start
LH: loop header
LB: loop body
LE: loop exit
PB: predicated region body
PF: predicated region fallthrough
CT: control target
= control target key end

     0   :  { %vm462_vm0 = vcmask 261120   ;;  %s1204_s24 = smov 64   ;;  %s1205_s25 = smov 32   ;;  %vm1206_vm1 = vmmov 0   ;;  %vm480_vm2 = vcmask 523264   ;;  %vm482_vm3 = vcmask 785408   ;;  %s1804_s1 = inlined_call_operand.vmem [shape: f32[1024,32], index: 1, kind: input, shape index: {}]   ;;  %s1805_s0 = inlined_call_operand.vmem [shape: f32[8,1024], index: 0, kind: input, shape index: {}]   ;;  %s1806_s2 = inlined_call_operand.vmem [shape: f32[1,32], index: 2, kind: input, shape index: {}]   ;;  %s1807_s3 = inlined_call_operand.vmem [shape: f32[128,64], index: 3, kind: input, shape index: {}]   ;;  %s1808_s7 = inlined_call_operand.vmem [shape: f32[64,32], index: 7, kind: input, shape index: {}]   ;;  %s1809_s5 = inlined_call_operand.vmem [shape: f32[1,128], index: 5, kind: input, shape index: {}]   ;;  %s1810_s6 = inlined_call_operand.vmem [shape: f32[1,128], index: 6, kind: input, shape index: {}]   ;;  %s1811_s4 = inlined_call_operand.vmem [shape: f32[1,64], index: 4, kind: input, shape index: {}]   ;;  %s1812_s9 = inlined_call_operand.vmem [shape: f32[32,2], index: 9, kind: input, shape index: {}]   ;;  %s1813_s8 = inlined_call_operand.vmem [shape: f32[1,32], index: 8, kind: input, shape index: {}]   ;;  %s1814_s10 = inlined_call_operand.vmem [shape: f32[1,2], index: 10, kind: input, shape index: {}]   ;;  %s1815_s11 = inlined_call_operand.vmem [shape: f32[8,2], index: 11, kind: output, shape index: {}]  }
   0x1   :  { %v62_v0 = vld [vmem:[%s1804_s1 + $0x80] sm:$0xff]  ;;  %v63_v1 = vld [vmem:[%s1804_s1 + $0x88] sm:$0xff]  ;;  %v64_v11 = vld [vmem:[%s1804_s1 + $0x90] sm:$0xff]  ;;  %s1208_s15 = smov 96   ;;  %vm771_vm4 = vcmask 15360  }
   0x2   :  { %v46_v2 = vld [vmem:[%s1804_s1] sm:$0xff]  ;;  %v1021_v3 = vpack.c.bf16 %v63_v1, %v62_v0  ;;  %v47_v4 = vld [vmem:[%s1804_s1 + $0x8] sm:$0xff]  ;;  %v65_v13 = vld [vmem:[%s1804_s1 + $0x98] sm:$0xff] }
   0x3   :  { %v94_v5 = vld [vmem:[%s1804_s1 + $0x180] sm:$0xff]  ;;  %v95_v6 = vld [vmem:[%s1804_s1 + $0x188] sm:$0xff]  ;;  %v1023_v7 = vpack.c.bf16 %v47_v4, %v46_v2  ;;  %v48_v14 = vld [vmem:[%s1804_s1 + $0x10] sm:$0xff]  ;;  %v1025_v16 = vpack.c.bf16 %v65_v13, %v64_v11 }
   0x4   :  { %v1053_v8 = vpack.c.bf16 %v95_v6, %v94_v5  ;;  %v78_v9 = vld [vmem:[%s1804_s1 + $0x100] sm:$0xff]  ;;  %v79_v10 = vld [vmem:[%s1804_s1 + $0x108] sm:$0xff]  ;;  %1022 = vmatprep.subr.bf16.mxu0 %v1021_v3  ;;  %v49_v15 = vld [vmem:[%s1804_s1 + $0x18] sm:$0xff] }
   0x5   :  { %v1055_v12 = vpack.c.bf16 %v79_v10, %v78_v9  ;;  %1024 = vmatpush3.bf16.msra.mxu0 %v1023_v7  ;;  %v1027_v17 = vpack.c.bf16 %v49_v15, %v48_v14  ;;  %v96_v18 = vld [vmem:[%s1804_s1 + $0x190] sm:$0xff]  ;;  %v97_v19 = vld [vmem:[%s1804_s1 + $0x198] sm:$0xff]  ;;  %v66_v23 = vld [vmem:[%s1804_s1 + $0xa0] sm:$0xff] }
   0x6   :  { %1054 = vmatprep.subr.bf16.mxu1 %v1053_v8  ;;  %v80_v20 = vld [vmem:[%s1804_s1 + $0x110] sm:$0xff]  ;;  %v1057_v21 = vpack.c.bf16 %v97_v19, %v96_v18  ;;  %v81_v22 = vld [vmem:[%s1804_s1 + $0x118] sm:$0xff]  ;;  %v67_v24 = vld [vmem:[%s1804_s1 + $0xa8] sm:$0xff]  ;;  %1026 = vmatprep.subr.bf16.mxu0 %v1025_v16 }
   0x7   :  { %1056 = vmatpush3.bf16.msra.mxu1 %v1055_v12  ;;  %v1059_v25 = vpack.c.bf16 %v81_v22, %v80_v20  ;;  %v1029_v26 = vpack.c.bf16 %v67_v24, %v66_v23  ;;  %v50_v27 = vld [vmem:[%s1804_s1 + $0x20] sm:$0xff]  ;;  %v51_v28 = vld [vmem:[%s1804_s1 + $0x28] sm:$0xff]  ;;  %v68_v35 = vld [vmem:[%s1804_s1 + $0xb0] sm:$0xff] }
   0x8   :  { %v98_v29 = vld [vmem:[%s1804_s1 + $0x1a0] sm:$0xff]  ;;  %1058 = vmatprep.subr.bf16.mxu1 %v1057_v21  ;;  %v99_v30 = vld [vmem:[%s1804_s1 + $0x1a8] sm:$0xff]  ;;  %v1031_v33 = vpack.c.bf16 %v51_v28, %v50_v27  ;;  %v69_v36 = vld [vmem:[%s1804_s1 + $0xb8] sm:$0xff] }
   0x9   :  { %v82_v31 = vld [vmem:[%s1804_s1 + $0x120] sm:$0xff]  ;;  %v83_v32 = vld [vmem:[%s1804_s1 + $0x128] sm:$0xff]  ;;  %1028 = vmatpush3.bf16.msra.mxu0 %v1027_v17  ;;  %v1061_v34 = vpack.c.bf16 %v99_v30, %v98_v29  ;;  %v52_v37 = vld [vmem:[%s1804_s1 + $0x30] sm:$0xff]  ;;  %v1033_v39 = vpack.c.bf16 %v69_v36, %v68_v35 }
   0xa   :  { %1030 = vmatprep.subr.bf16.mxu0 %v1029_v26  ;;  %v1063_v38 = vpack.c.bf16 %v83_v32, %v82_v31  ;;  %v53_v40 = vld [vmem:[%s1804_s1 + $0x38] sm:$0xff]  ;;  %v100_v41 = vld [vmem:[%s1804_s1 + $0x1b0] sm:$0xff]  ;;  %v70_v46 = vld [vmem:[%s1804_s1 + $0xc0] sm:$0xff] }
   0xb   :  { %1060 = vmatpush3.bf16.msra.mxu1 %v1059_v25  ;;  %v101_v42 = vld [vmem:[%s1804_s1 + $0x1b8] sm:$0xff]  ;;  %v84_v44 = vld [vmem:[%s1804_s1 + $0x130] sm:$0xff]  ;;  %v71_v47 = vld [vmem:[%s1804_s1 + $0xc8] sm:$0xff]  ;;  %v1035_v48 = vpack.c.bf16 %v53_v40, %v52_v37 }
   0xc   :  { %1062 = vmatprep.subr.bf16.mxu1 %v1061_v34  ;;  %v1065_v43 = vpack.c.bf16 %v101_v42, %v100_v41  ;;  %v85_v45 = vld [vmem:[%s1804_s1 + $0x138] sm:$0xff]  ;;  %v102_v49 = vld [vmem:[%s1804_s1 + $0x1c0] sm:$0xff]  ;;  %v103_v50 = vld [vmem:[%s1804_s1 + $0x1c8] sm:$0xff]  ;;  %v1037_v52 = vpack.c.bf16 %v71_v47, %v70_v46 }
   0xd   :  { %1032 = vmatpush3.bf16.msra.mxu0 %v1031_v33  ;;  %v1067_v51 = vpack.c.bf16 %v85_v45, %v84_v44  ;;  %v54_v53 = vld [vmem:[%s1804_s1 + $0x40] sm:$0xff]  ;;  %v55_v54 = vld [vmem:[%s1804_s1 + $0x48] sm:$0xff]  ;;  %v1069_v56 = vpack.c.bf16 %v103_v50, %v102_v49  ;;  %v72_v58 = vld [vmem:[%s1804_s1 + $0xd0] sm:$0xff] }
   0xe   :  { %1034 = vmatprep.subr.bf16.mxu0 %v1033_v39  ;;  %v86_v55 = vld [vmem:[%s1804_s1 + $0x140] sm:$0xff]  ;;  %v87_v57 = vld [vmem:[%s1804_s1 + $0x148] sm:$0xff]  ;;  %v73_v59 = vld [vmem:[%s1804_s1 + $0xd8] sm:$0xff]  ;;  %v1039_v62 = vpack.c.bf16 %v55_v54, %v54_v53 }
   0xf   :  { %1064 = vmatpush3.bf16.msra.mxu1 %v1063_v38  ;;  %v104_v60 = vld [vmem:[%s1804_s1 + $0x1d0] sm:$0xff]  ;;  %v105_v61 = vld [vmem:[%s1804_s1 + $0x1d8] sm:$0xff]  ;;  %v1071_v63 = vpack.c.bf16 %v87_v57, %v86_v55  ;;  %v1041_v0 = vpack.c.bf16 %v73_v59, %v72_v58  ;;  %v74_v6 = vld [vmem:[%s1804_s1 + $0xe0] sm:$0xff] }
  0x10   :  { %1066 = vmatprep.subr.bf16.mxu1 %v1065_v43  ;;  %v56_v1 = vld [vmem:[%s1804_s1 + $0x50] sm:$0xff]  ;;  %v57_v2 = vld [vmem:[%s1804_s1 + $0x58] sm:$0xff]  ;;  %v1073_v4 = vpack.c.bf16 %v105_v61, %v104_v60  ;;  %v75_v7 = vld [vmem:[%s1804_s1 + $0xe8] sm:$0xff] }
  0x11   :  { %1036 = vmatpush3.bf16.msra.mxu0 %v1035_v48  ;;  %v88_v3 = vld [vmem:[%s1804_s1 + $0x150] sm:$0xff]  ;;  %v89_v5 = vld [vmem:[%s1804_s1 + $0x158] sm:$0xff]  ;;  %v106_v8 = vld [vmem:[%s1804_s1 + $0x1e0] sm:$0xff]  ;;  %v1043_v10 = vpack.c.bf16 %v57_v2, %v56_v1  ;;  %v1045_v14 = vpack.c.bf16 %v75_v7, %v74_v6 }
  0x12   :  { %1038 = vmatprep.subr.bf16.mxu0 %v1037_v52  ;;  %v107_v9 = vld [vmem:[%s1804_s1 + $0x1e8] sm:$0xff]  ;;  %v58_v11 = vld [vmem:[%s1804_s1 + $0x60] sm:$0xff]  ;;  %v1075_v13 = vpack.c.bf16 %v89_v5, %v88_v3  ;;  %v76_v19 = vld [vmem:[%s1804_s1 + $0xf0] sm:$0xff] }
  0x13   :  { %1068 = vmatpush3.bf16.msra.mxu1 %v1067_v51  ;;  %v59_v12 = vld [vmem:[%s1804_s1 + $0x68] sm:$0xff]  ;;  %v90_v15 = vld [vmem:[%s1804_s1 + $0x160] sm:$0xff]  ;;  %v1077_v18 = vpack.c.bf16 %v107_v9, %v106_v8  ;;  %v77_v20 = vld [vmem:[%s1804_s1 + $0xf8] sm:$0xff] }
  0x14   :  { %1070 = vmatprep.subr.bf16.mxu1 %v1069_v56  ;;  %v91_v16 = vld [vmem:[%s1804_s1 + $0x168] sm:$0xff]  ;;  %v41_v21 = vld [vmem:[%s1805_s0 + $0x18] sm:$0xff]  ;;  %v108_v22 = vld [vmem:[%s1804_s1 + $0x1f0] sm:$0xff]  ;;  %v1047_v24 = vpack.c.bf16 %v59_v12, %v58_v11  ;;  %v1049_v26 = vpack.c.bf16 %v77_v20, %v76_v19 }
  0x15   :  { %1040 = vmatpush3.bf16.msra.mxu0 %v1039_v62  ;;  %v39_v17 = vld [vmem:[%s1805_s0 + $0x8] sm:$0xff]  ;;  %v109_v23 = vld [vmem:[%s1804_s1 + $0x1f8] sm:$0xff]  ;;  %315 = vmatprep.mubr.f32.mxu1 %v41_v21  ;;  %v1079_v25 = vpack.c.bf16 %v91_v16, %v90_v15  ;;  %v60_v27 = vld [vmem:[%s1804_s1 + $0x70] sm:$0xff] }
  0x16   :  { %1042 = vmatprep.subr.bf16.mxu0 %v1041_v0  ;;  %245 = vmatprep.mubr.f32.mxu0 %v39_v17  ;;  %v61_v28 = vld [vmem:[%s1804_s1 + $0x78] sm:$0xff]  ;;  %v92_v29 = vld [vmem:[%s1804_s1 + $0x170] sm:$0xff]  ;;  %v1081_v30 = vpack.c.bf16 %v109_v23, %v108_v22  ;;  %v126_v32 = vld [vmem:[%s1804_s1 + $0x280] sm:$0xff] }
  0x17   :  { %1072 = vmatpush3.bf16.msra.mxu1 %v1071_v63  ;;  %v93_v31 = vld [vmem:[%s1804_s1 + $0x178] sm:$0xff]  ;;  %v127_v33 = vld [vmem:[%s1804_s1 + $0x288] sm:$0xff]  ;;  %v158_v34 = vld [vmem:[%s1804_s1 + $0x380] sm:$0xff]  ;;  %v1051_v36 = vpack.c.bf16 %v61_v28, %v60_v27 }
  0x18   :  { %1074 = vmatprep.subr.bf16.mxu1 %v1073_v4  ;;  %v159_v35 = vld [vmem:[%s1804_s1 + $0x388] sm:$0xff]  ;;  %v1083_v37 = vpack.c.bf16 %v93_v31, %v92_v29  ;;  %v1085_v38 = vpack.c.bf16 %v127_v33, %v126_v32  ;;  %v110_v39 = vld [vmem:[%s1804_s1 + $0x200] sm:$0xff]  ;;  %v128_v44 = vld [vmem:[%s1804_s1 + $0x290] sm:$0xff] }
  0x19   :  { %1044 = vmatpush3.bf16.msra.mxu0 %v1043_v10  ;;  %v111_v40 = vld [vmem:[%s1804_s1 + $0x208] sm:$0xff]  ;;  %v142_v41 = vld [vmem:[%s1804_s1 + $0x300] sm:$0xff]  ;;  %v1117_v42 = vpack.c.bf16 %v159_v35, %v158_v34  ;;  %v129_v45 = vld [vmem:[%s1804_s1 + $0x298] sm:$0xff] }
  0x1a   :  { %1046 = vmatprep.subr.bf16.mxu0 %v1045_v14  ;;  %v143_v43 = vld [vmem:[%s1804_s1 + $0x308] sm:$0xff]  ;;  %v160_v46 = vld [vmem:[%s1804_s1 + $0x390] sm:$0xff]  ;;  %v161_v47 = vld [vmem:[%s1804_s1 + $0x398] sm:$0xff]  ;;  %v1087_v49 = vpack.c.bf16 %v111_v40, %v110_v39  ;;  %v1089_v52 = vpack.c.bf16 %v129_v45, %v128_v44 }
  0x1b   :  { %1076 = vmatpush3.bf16.msra.mxu1 %v1075_v13  ;;  %v38_v48 = vld [vmem:[%s1805_s0] sm:$0xff]  ;;  %v40_v50 = vld [vmem:[%s1805_s0 + $0x10] sm:$0xff]  ;;  %v1119_v51 = vpack.c.bf16 %v143_v43, %v142_v41  ;;  %v113_v54 = vld [vmem:[%s1804_s1 + $0x218] sm:$0xff]  ;;  %v1121_v56 = vpack.c.bf16 %v161_v47, %v160_v46 }
  0x1c   :  { %1078 = vmatprep.subr.bf16.mxu1 %v1077_v18  ;;  %v112_v53 = vld [vmem:[%s1804_s1 + $0x210] sm:$0xff]  ;;  %v145_v57 = vld [vmem:[%s1804_s1 + $0x318] sm:$0xff]  ;;  %v130_v58 = vld [vmem:[%s1804_s1 + $0x2a0] sm:$0xff] }
  0x1d   :  { %1048 = vmatpush3.bf16.msra.mxu0 %v1047_v24  ;;  %v144_v55 = vld [vmem:[%s1804_s1 + $0x310] sm:$0xff]  ;;  %v131_v59 = vld [vmem:[%s1804_s1 + $0x2a8] sm:$0xff]  ;;  %v162_v60 = vld [vmem:[%s1804_s1 + $0x3a0] sm:$0xff]  ;;  %v1091_v62 = vpack.c.bf16 %v113_v54, %v112_v53 }
  0x1e   :  { %1050 = vmatprep.subr.bf16.mxu0 %v1049_v26  ;;  %v163_v61 = vld [vmem:[%s1804_s1 + $0x3a8] sm:$0xff]  ;;  %v1123_v63 = vpack.c.bf16 %v145_v57, %v144_v55  ;;  %v1093_v0 = vpack.c.bf16 %v131_v59, %v130_v58  ;;  %v114_v1 = vld [vmem:[%s1804_s1 + $0x220] sm:$0xff]  ;;  %v132_v6 = vld [vmem:[%s1804_s1 + $0x2b0] sm:$0xff] }
  0x1f   :  { %1080 = vmatpush3.bf16.msra.mxu1 %v1079_v25  ;;  %v115_v2 = vld [vmem:[%s1804_s1 + $0x228] sm:$0xff]  ;;  %v146_v3 = vld [vmem:[%s1804_s1 + $0x320] sm:$0xff]  ;;  %v1125_v4 = vpack.c.bf16 %v163_v61, %v162_v60  ;;  %v133_v7 = vld [vmem:[%s1804_s1 + $0x2b8] sm:$0xff] }
  0x20   :  { %1082 = vmatprep.subr.bf16.mxu1 %v1081_v30  ;;  %v147_v5 = vld [vmem:[%s1804_s1 + $0x328] sm:$0xff]  ;;  %v164_v8 = vld [vmem:[%s1804_s1 + $0x3b0] sm:$0xff]  ;;  %v165_v9 = vld [vmem:[%s1804_s1 + $0x3b8] sm:$0xff]  ;;  %v1095_v10 = vpack.c.bf16 %v115_v2, %v114_v1  ;;  %v1097_v12 = vpack.c.bf16 %v133_v7, %v132_v6 }
  0x21   :  { %1052 = vmatpush3.bf16.msra.mxu0 %v1051_v36  ;;  %v1127_v11 = vpack.c.bf16 %v147_v5, %v146_v3  ;;  %v116_v13 = vld [vmem:[%s1804_s1 + $0x230] sm:$0xff]  ;;  %v117_v14 = vld [vmem:[%s1804_s1 + $0x238] sm:$0xff]  ;;  %v1129_v16 = vpack.c.bf16 %v165_v9, %v164_v8  ;;  %v134_v18 = vld [vmem:[%s1804_s1 + $0x2c0] sm:$0xff] }
  0x22   :  { %1086 = vmatprep.subr.bf16.mxu0 %v1085_v38  ;;  %v148_v15 = vld [vmem:[%s1804_s1 + $0x330] sm:$0xff]  ;;  %v149_v17 = vld [vmem:[%s1804_s1 + $0x338] sm:$0xff]  ;;  %v135_v19 = vld [vmem:[%s1804_s1 + $0x2c8] sm:$0xff]  ;;  %v1099_v22 = vpack.c.bf16 %v117_v14, %v116_v13 }
  0x23   :  { %1084 = vmatpush3.bf16.msra.mxu1 %v1083_v37  ;;  %v166_v20 = vld [vmem:[%s1804_s1 + $0x3c0] sm:$0xff]  ;;  %v167_v21 = vld [vmem:[%s1804_s1 + $0x3c8] sm:$0xff]  ;;  %v45_v24 = vld [vmem:[%s1805_s0 + $0x38] sm:$0xff]  ;;  %v1131_v25 = vpack.c.bf16 %v149_v17, %v148_v15  ;;  %v1101_v26 = vpack.c.bf16 %v135_v19, %v134_v18 }
  0x24   :  { %1118 = vmatprep.subr.bf16.mxu1 %v1117_v42  ;;  %246 = vmatmul.mubr.f32.vlgmr.msra.gmra.mrb[0].mxu0 %v38_v48  ;;  %v43_v23 = vld [vmem:[%s1805_s0 + $0x28] sm:$0xff]  ;;  %v118_v27 = vld [vmem:[%s1804_s1 + $0x240] sm:$0xff]  ;;  %v1133_v30 = vpack.c.bf16 %v167_v21, %v166_v20  ;;  %v136_v32 = vld [vmem:[%s1804_s1 + $0x2d0] sm:$0xff] }
  0x25   :  { %1088 = vmatpush3.bf16.msra.mxu0 %v1087_v49  ;;  %v119_v28 = vld [vmem:[%s1804_s1 + $0x248] sm:$0xff]  ;;  %v150_v29 = vld [vmem:[%s1804_s1 + $0x340] sm:$0xff]  ;;  %v137_v33 = vld [vmem:[%s1804_s1 + $0x2d8] sm:$0xff]  ;;  %385 = vmatprep.mubr.f32.mxu0 %v43_v23 }
  0x26   :  { %316 = vmatmul.mubr.f32.vlgmr.msra.gmra.mrb[0].mxu1 %v40_v50  ;;  %1090 = vmatprep.subr.bf16.mxu0 %v1089_v52  ;;  %v151_v31 = vld [vmem:[%s1804_s1 + $0x348] sm:$0xff]  ;;  %v168_v34 = vld [vmem:[%s1804_s1 + $0x3d0] sm:$0xff]  ;;  %v169_v35 = vld [vmem:[%s1804_s1 + $0x3d8] sm:$0xff]  ;;  %v1103_v36 = vpack.c.bf16 %v119_v28, %v118_v27  ;;  %v1105_v38 = vpack.c.bf16 %v137_v33, %v136_v32  ;;  %v1203_v27 = vmov 0.0|0.0  }
  0x27   :  { %1120 = vmatpush3.bf16.msra.mxu1 %v1119_v51  ;;  %455 = vmatprep.mubr.f32.mxu1 %v45_v24  ;;  %v1135_v37 = vpack.c.bf16 %v151_v31, %v150_v29  ;;  %v120_v39 = vld [vmem:[%s1804_s1 + $0x250] sm:$0xff]  ;;  %v121_v40 = vld [vmem:[%s1804_s1 + $0x258] sm:$0xff]  ;;  %v1137_v42 = vpack.c.bf16 %v169_v35, %v168_v34  ;;  %v138_v44 = vld [vmem:[%s1804_s1 + $0x2e0] sm:$0xff] }
  0x28   :  { %1122 = vmatprep.subr.bf16.mxu1 %v1121_v56  ;;  %v152_v41 = vld [vmem:[%s1804_s1 + $0x350] sm:$0xff]  ;;  %v153_v43 = vld [vmem:[%s1804_s1 + $0x358] sm:$0xff]  ;;  %v139_v45 = vld [vmem:[%s1804_s1 + $0x2e8] sm:$0xff]  ;;  %v1107_v48 = vpack.c.bf16 %v121_v40, %v120_v39 }
  0x29   :  { %1092 = vmatpush3.bf16.msra.mxu0 %v1091_v62  ;;  %v170_v46 = vld [vmem:[%s1804_s1 + $0x3e0] sm:$0xff]  ;;  %v171_v47 = vld [vmem:[%s1804_s1 + $0x3e8] sm:$0xff]  ;;  %v1139_v49 = vpack.c.bf16 %v153_v43, %v152_v41  ;;  %v1109_v50 = vpack.c.bf16 %v139_v45, %v138_v44  ;;  %v140_v56 = vld [vmem:[%s1804_s1 + $0x2f0] sm:$0xff] }
  0x2a   :  { %1094 = vmatprep.subr.bf16.mxu0 %v1093_v0  ;;  %v122_v51 = vld [vmem:[%s1804_s1 + $0x260] sm:$0xff]  ;;  %v123_v52 = vld [vmem:[%s1804_s1 + $0x268] sm:$0xff]  ;;  %v1141_v54 = vpack.c.bf16 %v171_v47, %v170_v46  ;;  %v141_v57 = vld [vmem:[%s1804_s1 + $0x2f8] sm:$0xff] }
  0x2b   :  { %1124 = vmatpush3.bf16.msra.mxu1 %v1123_v63  ;;  %v154_v53 = vld [vmem:[%s1804_s1 + $0x360] sm:$0xff]  ;;  %v155_v55 = vld [vmem:[%s1804_s1 + $0x368] sm:$0xff]  ;;  %v172_v58 = vld [vmem:[%s1804_s1 + $0x3f0] sm:$0xff]  ;;  %v1111_v60 = vpack.c.bf16 %v123_v52, %v122_v51  ;;  %v1113_v62 = vpack.c.bf16 %v141_v57, %v140_v56 }
  0x2c   :  { %1126 = vmatprep.subr.bf16.mxu1 %v1125_v4  ;;  %v173_v59 = vld [vmem:[%s1804_s1 + $0x3f8] sm:$0xff]  ;;  %v1143_v61 = vpack.c.bf16 %v155_v55, %v154_v53  ;;  %v124_v63 = vld [vmem:[%s1804_s1 + $0x270] sm:$0xff]  ;;  %v42_v6 = vld [vmem:[%s1805_s0 + $0x20] sm:$0xff]  ;;  %v1207_v55 = vmov 0.0  }
  0x2d   :  { %1096 = vmatpush3.bf16.msra.mxu0 %v1095_v10  ;;  %v125_v0 = vld [vmem:[%s1804_s1 + $0x278] sm:$0xff]  ;;  %v1145_v1 = vpack.c.bf16 %v173_v59, %v172_v58  ;;  %v156_v2 = vld [vmem:[%s1804_s1 + $0x370] sm:$0xff]  ;;  %v777_v9 = vld [vmem:[%s1806_s2] ss:$0 sm:$0xff] }
  0x2e   :  { %1098 = vmatprep.subr.bf16.mxu0 %v1097_v12  ;;  %v157_v3 = vld [vmem:[%s1804_s1 + $0x378] sm:$0xff]  ;;  %v1115_v4 = vpack.c.bf16 %v125_v0, %v124_v63  ;;  %v44_v7 = vld [vmem:[%s1805_s0 + $0x30] sm:$0xff]  ;;  %v504_v28 = vld [vmem:[%s1807_s3] sm:$0xff] }
  0x2f   :  { %1128 = vmatpush3.bf16.msra.mxu1 %v1127_v11  ;;  %v1147_v5 = vpack.c.bf16 %v157_v3, %v156_v2  ;;  %v505_v29 = vld [vmem:[%s1807_s3 + $0x8] sm:$0xff]  ;;  %v507_v32 = vld [vmem:[%s1807_s3 + $0x18] sm:$0xff]  ;;  %v510_v39 = vld [vmem:[%s1807_s3 + $0x30] sm:$0xff] }
  0x30   :  { %1130 = vmatprep.subr.bf16.mxu1 %v1129_v16  ;;  %v1150_v31 = vpack.c.bf16 %v505_v29, %v504_v28  ;;  %v511_v40 = vld [vmem:[%s1807_s3 + $0x38] sm:$0xff]  ;;  %v513_v43 = vld [vmem:[%s1807_s3 + $0x48] sm:$0xff]  ;;  %v514_v47 = vld [vmem:[%s1807_s3 + $0x50] sm:$0xff] }
  0x31   :  { %1100 = vmatpush3.bf16.msra.mxu0 %v1099_v22  ;;  %v1159_v41 = vpack.c.bf16 %v511_v40, %v510_v39  ;;  %v517_v51 = vld [vmem:[%s1807_s3 + $0x68] sm:$0xff]  ;;  %v518_v53 = vld [vmem:[%s1807_s3 + $0x70] sm:$0xff]  ;;  %v598_v57 = vld [vmem:[%s1808_s7] sm:$0xff] }
  0x32   :  { %1102 = vmatprep.subr.bf16.mxu0 %v1101_v26  ;;  %v599_v58 = vld [vmem:[%s1808_s7 + $0x8] sm:$0xff]  ;;  %v600_v59 = vld [vmem:[%s1808_s7 + $0x10] sm:$0xff]  ;;  %v602_v63 = vld [vmem:[%s1808_s7 + $0x20] sm:$0xff] }
  0x33   :  { %1132 = vmatpush3.bf16.msra.mxu1 %v1131_v25  ;;  %v603_v0 = vld [vmem:[%s1808_s7 + $0x28] sm:$0xff]  ;;  %v690_v29 = vld [vmem:[%s1812_s9 + $0x18] sm:$0xff] }
  0x34   :  { %1134 = vmatprep.subr.bf16.mxu1 %v1133_v30  ;;  %v506_v30 = vld [vmem:[%s1807_s3 + $0x10] sm:$0xff] }
  0x35   :  { %1104 = vmatpush3.bf16.msra.mxu0 %v1103_v36  ;;  %v1153_v33 = vpack.c.bf16 %v507_v32, %v506_v30  ;;  %v508_v36 = vld [vmem:[%s1807_s3 + $0x20] sm:$0xff] }
  0x36   :  { %1106 = vmatprep.subr.bf16.mxu0 %v1105_v38 }
  0x37   :  { %1136 = vmatpush3.bf16.msra.mxu1 %v1135_v37  ;;  %v509_v37 = vld [vmem:[%s1807_s3 + $0x28] sm:$0xff] }
  0x38   :  { %1138 = vmatprep.subr.bf16.mxu1 %v1137_v42  ;;  %v1156_v38 = vpack.c.bf16 %v509_v37, %v508_v36  ;;  %v512_v42 = vld [vmem:[%s1807_s3 + $0x40] sm:$0xff] }
  0x39   :  { %1108 = vmatpush3.bf16.msra.mxu0 %v1107_v48  ;;  %v1162_v44 = vpack.c.bf16 %v513_v43, %v512_v42  ;;  %v515_v48 = vld [vmem:[%s1807_s3 + $0x58] sm:$0xff]  ;;  %v783_v36 = vld [vmem:[%s1814_s10] ss:$0 sm:$0xff] }
  0x3a   :  { %1110 = vmatprep.subr.bf16.mxu0 %v1109_v50  ;;  %v516_v50 = vld [vmem:[%s1807_s3 + $0x60] sm:$0xff] }
  0x3b   :  { %1140 = vmatpush3.bf16.msra.mxu1 %v1139_v49  ;;  %v1165_v49 = vpack.c.bf16 %v515_v48, %v514_v47  ;;  %v1168_v52 = vpack.c.bf16 %v517_v51, %v516_v50 }
  0x3c   :  { %1142 = vmatprep.subr.bf16.mxu1 %v1141_v54  ;;  %v519_v54 = vld [vmem:[%s1807_s3 + $0x78] sm:$0xff] }
  0x3d   :  { %1112 = vmatpush3.bf16.msra.mxu0 %v1111_v60  ;;  %v1171_v56 = vpack.c.bf16 %v519_v54, %v518_v53  ;;  %v1174_v60 = vpack.c.bf16 %v599_v58, %v598_v57 }
  0x3e   :  { %1114 = vmatprep.subr.bf16.mxu0 %v1113_v62 }
  0x3f   :  { %1144 = vmatpush3.bf16.msra.mxu1 %v1143_v61  ;;  %v601_v61 = vld [vmem:[%s1808_s7 + $0x18] sm:$0xff] }
  0x40   :  { %1146 = vmatprep.subr.bf16.mxu1 %v1145_v1  ;;  %v1177_v62 = vpack.c.bf16 %v601_v61, %v600_v59  ;;  %v1180_v1 = vpack.c.bf16 %v603_v0, %v602_v63 }
  0x41   :  { %1116 = vmatpush3.bf16.msra.mxu0 %v1115_v4 }
  0x42   :  { %1149 = vmatprep.subr.bf16.mxu0 %v1203_v27 }
  0x43   :  { %1148 = vmatpush3.bf16.msra.mxu1 %v1147_v5  ;;  %v778_v5 = vld [vmem:[%s1809_s5] ss:$0 sm:$0xff] }
  0x44   :  { %386 = vmatmul.mubr.f32.vlgmr.msra.gmra.mrb[2].mxu0 %v42_v6  ;;  %1173 = vmatprep.subr.bf16.mxu1 %v1203_v27 }
  0x45   :  { %1151 = vmatpush3.bf16.msra.mxu0 %v1150_v31  ;;  %988 = vmatprep.mubr.msk.f32.mxu0 %vm1206_vm1, %v1207_v55  ;;  %v781_v31 = vld [vmem:[%s1813_s8] ss:$0 sm:$0xff] }
  0x46   :  { %456 = vmatmul.mubr.f32.vlgmr.msra.gmra.mrb[2].mxu1 %v44_v7  ;;  %1152 = vmatprep.subr.bf16.mxu0 %v1203_v27 }
  0x47   :  { %1007 = vmatprep.mubr.msk.f32.mxu1 %vm1206_vm1, %v1207_v55  ;;  %1175 = vmatpush3.bf16.msra.mxu1 %v1174_v60 }
  0x48   :  { %1176 = vmatprep.subr.bf16.mxu1 %v1203_v27 }
  0x49   :  { %1154 = vmatpush3.bf16.msra.mxu0 %v1153_v33 }
  0x4a   :  { %1155 = vmatprep.subr.bf16.mxu0 %v1203_v27 }
  0x4b   :  { %1178 = vmatpush3.bf16.msra.mxu1 %v1177_v62 }
  0x4c   :  { %1179 = vmatprep.subr.bf16.mxu1 %v1203_v27 }
  0x4d   :  { %1157 = vmatpush3.bf16.msra.mxu0 %v1156_v38 }
  0x4e   :  { %1158 = vmatprep.subr.bf16.mxu0 %v1203_v27 }
  0x4f   :  { %1181 = vmatpush3.bf16.msra.mxu1 %v1180_v1 }
  0x50   :  { %1182 = vmatprep.subr.bf16.mxu1 %v1203_v27 }
  0x51   :  { %1160 = vmatpush3.bf16.msra.mxu0 %v1159_v41 }
  0x52   :  { %1161 = vmatprep.subr.bf16.mxu0 %v1203_v27 }
  0x55   :  { %1163 = vmatpush3.bf16.msra.mxu0 %v1162_v44 }
  0x56   :  { %1164 = vmatprep.subr.bf16.mxu0 %v1203_v27 }
  0x59   :  { %1166 = vmatpush3.bf16.msra.mxu0 %v1165_v49 }
  0x5a   :  { %1167 = vmatprep.subr.bf16.mxu0 %v1203_v27 }
  0x5d   :  { %1169 = vmatpush3.bf16.msra.mxu0 %v1168_v52 }
  0x5e   :  { %1170 = vmatprep.subr.bf16.mxu0 %v1203_v27 }
  0x61   :  { %1172 = vmatpush3.bf16.msra.mxu0 %v1171_v56 }
  0xf7   :  { %v817_v8 = vpop.f32.mrb[0].mxu0 }
  0xf8   :  { %v818_v10 = vpop.f32.mrb[1].mxu0 }
  0xf9   :  { %v852_v11 = vpop.f32.mrb[0].mxu1  ;;  %v819_v12 = vadd.f32 %v818_v10, %v817_v8 }
  0xfa   :  { %v853_v13 = vpop.f32.mrb[1].mxu1 }
  0xfb   :  { %v854_v14 = vadd.f32 %v853_v13, %v852_v11  ;;  %v248_v15 = vadd.f32 %v819_v12, %v777_v9  ;;  %v779_v11 = vld [vmem:[%s1810_s6] ss:$0 sm:$0xff] }
  0xfd   :  { %v318_v16 = vadd.f32 %v854_v14, %v248_v15 }
 0x117   :  { %v887_v17 = vpop.f32.mrb[2].mxu0 }
 0x118   :  { %v888_v18 = vpop.f32.mrb[3].mxu0 }
 0x119   :  { %v922_v19 = vpop.f32.mrb[2].mxu1  ;;  %v889_v20 = vadd.f32 %v888_v18, %v887_v17  ;;  %v605_v17 = vld [vmem:[%s1808_s7 + $0x38] sm:$0xff] }
 0x11a   :  { %v923_v21 = vpop.f32.mrb[3].mxu1 }
 0x11b   :  { %v924_v22 = vadd.f32 %v923_v21, %v922_v19  ;;  %v388_v23 = vadd.f32 %v889_v20, %v318_v16  ;;  %v604_v16 = vld [vmem:[%s1808_s7 + $0x30] sm:$0xff]  ;;  %v780_v19 = vld [vmem:[%s1811_s4] ss:$0 sm:$0xff] }
 0x11c   :  { %v1183_v18 = vpack.c.bf16 %v605_v17, %v604_v16 }
 0x11d   :  { %v458_v24 = vadd.f32 %v924_v22, %v388_v23 }
 0x11e   :  { %1184 = vmatpush3.bf16.msra.mxu1 %v1183_v18 }
 0x11f   :  { %v461_v25 = vmul.f32 %v458_v24, %v458_v24  ;;  %1185 = vmatprep.subr.bf16.mxu1 %v1203_v27 }
 0x121   :  { %v463_v26 = vsel %vm462_vm0, %v461_v25, 0.0  ;;  %v688_v25 = vld [vmem:[%s1812_s9 + $0x8] sm:$0xff] }
 0x122   :  { %464 = vadd.xlane.f32.xlu0 %v463_v26  ;;  %v689_v26 = vld [vmem:[%s1812_s9 + $0x10] sm:$0xff] }
 0x123   :  { %v1189_v30 = vpack.c.bf16 %v690_v29, %v689_v26 }
 0x1af   :  { %v465_v34 = vpop.xlane.xlu0 %464 }
 0x1b0   :  { %v466_v35 = vmax.f32 %v465_v34, 1e-24 }
 0x1b2   :  { %1197 = vrsqrt.f32 %v466_v35 }
 0x1bc   :  { %v1198_v45 = vpop.eup %1197 }
 0x1bd   :  { %v468_v46 = vmul.f32 %v1198_v45, %v458_v24  ;;  %v687_v24 = vld [vmem:[%s1812_s9] sm:$0xff] }
 0x1be   :  { %v1186_v28 = vpack.c.bf16 %v688_v25, %v687_v24 }
 0x1bf   :  { %473 = vrot.lane.b32.xlu1 %v468_v46, %s1204_s24  ;;  %470 = vrot.lane.b32.xlu0 %v468_v46, %s1205_s25 }
 0x1c3   :  { %476 = vrot.lane.b32.xlu1 %v468_v46, %s1208_s15 }
 0x231   :  { %v474_v2 = vpop.permute.xlu1 %473  ;;  %v471_v3 = vpop.permute.xlu0 %470 }
 0x232   :  { %v479_v4 = vsel %vm462_vm0, %v468_v46, %v471_v3 }
 0x233   :  { %v481_v7 = vsel %vm480_vm2, %v479_v4, %v474_v2 }
 0x235   :  { %v477_v6 = vpop.permute.xlu1 %476 }
 0x236   :  { %v483_v8 = vsel %vm482_vm3, %v481_v7, %v477_v6 }
 0x237   :  { %v491_v9 = vsub.f32 %v483_v8, %v778_v5 }
 0x239   :  { %v492_v10 = vmul.f32 %v491_v9, %v491_v9 }
 0x23b   :  { %v493_v12 = vsub.f32 0.0, %v492_v10 }
 0x23d   :  { %v501_v13 = vmul.f32 %v779_v11, %v493_v12 }
 0x23f   :  { %v502_v14 = vmul.f32 1.442695, %v501_v13 }
 0x241   :  { %1199 = vpow2.f32 %v502_v14 }
 0x24b   :  { %v1200_v15 = vpop.eup %1199 }
 0x24c   :  { %989 = vmatmul.mubr.f32.vlgmr.msra.gmra.mrb[4].mxu0 %v1200_v15 }
 0x31f   :  { %v593_v20 = vpop.f32.mrb[4].mxu0 }
 0x320   :  { %v594_v21 = vadd.f32 %v780_v19, %v593_v20  ;;  %v990_v22 = vpop.f32.mrb[5].mxu0 }
 0x322   :  { %v597_v23 = vmax.f32 %v594_v21, 0.0 }
 0x324   :  { %1008 = vmatmul.mubr.msk.f32.vlgmr.msra.gmra.mrb[4].mxu1 %vm480_vm2, %v597_v23 }
 0x325   :  { %1018 = vmatprep.mubr.msk.f32.mxu1 %vm1206_vm1, %v1207_v55  ;;  %1187 = vmatpush3.bf16.msra.mxu1 %v1186_v28 }
 0x326   :  { %1188 = vmatprep.subr.bf16.mxu1 %v1203_v27 }
 0x329   :  { %1190 = vmatpush3.bf16.msra.mxu1 %v1189_v30 }
 0x3f7   :  { %v682_v32 = vpop.f32.mrb[4].mxu1 }
 0x3f8   :  { %v683_v33 = vadd.f32 %v781_v31, %v682_v32  ;;  %v1009_v34 = vpop.f32.mrb[5].mxu1 }
 0x3fa   :  { %1201 = vtanh.f32 %v683_v33 }
 0x404   :  { %v1202_v35 = vpop.eup %1201 }
 0x405   :  { %1019 = vmatmul.mubr.msk.f32.vlgmr.msra.gmra.mrb[6].mxu1 %vm462_vm0, %v1202_v35 }
 0x4d8   :  { %v767_v37 = vpop.f32.mrb[6].mxu1 }
 0x4d9   :  { %v768_v38 = vadd.f32 %v783_v36, %v767_v37  ;;  %v1020_v27 = vpop.f32.mrb[7].mxu1 }
 0x4db   :  { %772 = vst.msk [vmem:[%s1815_s11] sm:$0xff] %vm771_vm4, %v768_v38 }

</bundles_post_ra>
